<compile_context>
chip_gen: v5e
topology: v5e:2x2
jax: 0.10.0
libtpu: 0.0.40
codegen_flags: <defaults>
</compile_context>

<pallas_src>
import jax
import jax.numpy as jnp
from jax.experimental import pallas as pl
from jax.experimental.pallas import tpu as pltpu


HIDDEN = 256
TILE_B = 512  # multiple of 256 -> fills the 2x256x256 MXU on v6e/v7x for layer 2


def critic_kernel(s_ref, a_ref, w1s_ref, w1a_ref, b1_ref, w2_ref, b2_ref,
                  w3_ref, b3_ref, o_ref):
    # bf16 operands into the MXU, f32 accumulation; bias/ReLU kept in f32.
    xs = s_ref[...].astype(jnp.bfloat16)                               # [T, S]
    xa = a_ref[...].astype(jnp.bfloat16)                               # [T, A]

    # Fused concat:  [xs, xa] @ W1  ==  xs @ W1_s + xa @ W1_a
    h1 = (jnp.dot(xs, w1s_ref[...], preferred_element_type=jnp.float32)
          + jnp.dot(xa, w1a_ref[...], preferred_element_type=jnp.float32)
          + b1_ref[...])
    h1 = jnp.maximum(h1, 0.0)                                          # [T, 256] f32

    h2 = jnp.dot(h1.astype(jnp.bfloat16), w2_ref[...],
                 preferred_element_type=jnp.float32) + b2_ref[...]
    h2 = jnp.maximum(h2, 0.0)                                          # [T, 256] f32

    out = jnp.dot(h2.astype(jnp.bfloat16), w3_ref[...],
                  preferred_element_type=jnp.float32)                  # [T, 1]

    # Lane-dense store: put the batch on the lane axis ([1, T] row).
    o_ref[...] = (out.T + b3_ref[...]).astype(o_ref.dtype)             # [1, T]


def critic_forward(state, action, params, *, tile_b=TILE_B):
    """state: [B, S], action: [B, A]; returns [B, 1] (f32)."""
    w1, b1, w2, b2, w3, b3 = params
    B, S = state.shape
    A = action.shape[1]
    din = S + A
    hid = w1.shape[1]

    # Split W1 (zero-cost slice) and pre-cast matmul weights to bf16.
    w1s = w1[:S].astype(jnp.bfloat16)
    w1a = w1[S:].astype(jnp.bfloat16)
    w2b = w2.astype(jnp.bfloat16)
    w3b = w3.astype(jnp.bfloat16)

    # Batch tiling; pad the (rare) ragged tail so every block is full.
    tile_b = min(tile_b, B)
    n_tiles = pl.cdiv(B, tile_b)
    b_pad = n_tiles * tile_b
    if b_pad != B:
        pad = b_pad - B
        state = jnp.pad(state, ((0, pad), (0, 0)))
        action = jnp.pad(action, ((0, pad), (0, 0)))

    flops = 2 * b_pad * (din * hid + hid * hid + hid)
    bytes_accessed = (b_pad * din * 4                       # state + action (f32)
                      + (din * hid + hid * hid + hid) * 2   # bf16 weights
                      + (2 * hid + 1) * 4                   # f32 biases
                      + b_pad * 4)                          # output

    out_row = pl.pallas_call(
        critic_kernel,
        out_shape=jax.ShapeDtypeStruct((1, b_pad), jnp.float32),
        grid=(n_tiles,),
        in_specs=[
            pl.BlockSpec((tile_b, S), lambda i: (i, 0)),    # state tile
            pl.BlockSpec((tile_b, A), lambda i: (i, 0)),    # action tile
            pl.BlockSpec((S, hid), lambda i: (0, 0)),       # W1_s   (resident)
            pl.BlockSpec((A, hid), lambda i: (0, 0)),       # W1_a   (resident)
            pl.BlockSpec((1, hid), lambda i: (0, 0)),       # b1     (resident)
            pl.BlockSpec((hid, hid), lambda i: (0, 0)),     # W2     (resident)
            pl.BlockSpec((1, hid), lambda i: (0, 0)),       # b2     (resident)
            pl.BlockSpec((hid, 1), lambda i: (0, 0)),       # W3     (resident)
            pl.BlockSpec((1, 1), lambda i: (0, 0)),         # b3     (resident)
        ],
        out_specs=pl.BlockSpec((1, tile_b), lambda i: (0, i)),
        compiler_params=pltpu.CompilerParams(
            dimension_semantics=("parallel",)),
        cost_estimate=pl.CostEstimate(
            flops=flops, transcendentals=0, bytes_accessed=bytes_accessed),
    )(state, action, w1s, w1a, b1, w2b, b2, w3b, b3)

    # [1, B_pad] lane-dense slab -> [B, 1] column expected by the caller.
    return out_row[0, :B].reshape(B, 1)


def init_params(key, state_size, action_size):
    """Deterministic init mimicking nn.Linear's U(-1/sqrt(fan_in), 1/sqrt(fan_in))."""
    din = state_size + action_size
    ks = jax.random.split(key, 6)

    def lin(kw, kb, fan_in, fan_out):
        bound = 1.0 / jnp.sqrt(jnp.float32(fan_in))
        w = jax.random.uniform(kw, (fan_in, fan_out), jnp.float32, -bound, bound)
        b = jax.random.uniform(kb, (1, fan_out), jnp.float32, -bound, bound)
        return w, b

    w1, b1 = lin(ks[0], ks[1], din, HIDDEN)
    w2, b2 = lin(ks[2], ks[3], HIDDEN, HIDDEN)
    w3, b3 = lin(ks[4], ks[5], HIDDEN, 1)
    return (w1, b1, w2, b2, w3, b3)


def critic_ref(state, action, params):
    """Pure-JAX f32 reference of the PyTorch forward pass."""
    w1, b1, w2, b2, w3, b3 = params
    x = jnp.concatenate([state, action], axis=1)
    x = jnp.maximum(x @ w1 + b1, 0.0)
    x = jnp.maximum(x @ w2 + b2, 0.0)
    return x @ w3 + b3


def critic_ref_mixed(state, action, params):
    """Reference mirroring the kernel's mixed precision (bf16 MXU inputs, f32 accum)."""
    w1, b1, w2, b2, w3, b3 = params
    bf = jnp.bfloat16
    x = jnp.concatenate([state, action], axis=1).astype(bf)
    h1 = jnp.maximum(
        jnp.dot(x, w1.astype(bf), preferred_element_type=jnp.float32) + b1, 0.0)
    h2 = jnp.maximum(
        jnp.dot(h1.astype(bf), w2.astype(bf), preferred_element_type=jnp.float32) + b2, 0.0)
    return jnp.dot(h2.astype(bf), w3.astype(bf), preferred_element_type=jnp.float32) + b3


if __name__ == "__main__":
    key = jax.random.PRNGKey(0)
    k_state, k_action, k_params = jax.random.split(key, 3)

    B, STATE, ACTION = 8, 16, 8  # small shapes consistent with the module
    state = jax.random.normal(k_state, (B, STATE), jnp.float32)
    action = jax.random.normal(k_action, (B, ACTION), jnp.float32)
    params = init_params(k_params, STATE, ACTION)

    out = jax.block_until_ready(critic_forward(state, action, params))
    assert out.shape == (B, 1), out.shape

    # Matches the mixed-precision (bf16-in / f32-accum) computation tightly.
    ref_mixed = critic_ref_mixed(state, action, params)
    assert jnp.allclose(out, ref_mixed, atol=1e-4, rtol=1e-4), "mismatch vs mixed ref"
    # Matches the full-f32 PyTorch semantics within bf16 rounding.
    ref_f32 = critic_ref(state, action, params)
    assert jnp.allclose(out, ref_f32, atol=2e-2, rtol=2e-2), "mismatch vs f32 ref"

    # Larger batch: exercises the batch grid, resident weights and tail padding.
    B2 = 1000
    k_s2, k_a2 = jax.random.split(jax.random.PRNGKey(1))
    state2 = jax.random.normal(k_s2, (B2, STATE), jnp.float32)
    action2 = jax.random.normal(k_a2, (B2, ACTION), jnp.float32)
    out2 = jax.block_until_ready(critic_forward(state2, action2, params))
    assert out2.shape == (B2, 1), out2.shape
    ref2 = critic_ref_mixed(state2, action2, params)
    assert jnp.allclose(out2, ref2, atol=1e-4, rtol=1e-4), "mismatch vs mixed ref (B=1000)"

    print("KERNEL_OK")
</pallas_src>

<mosaic_0001>
module attributes {stable_mosaic.version = 11 : i64} {
  func.func @critic_kernel(%arg0: i32, %arg1: memref<8x16xf32, #tpu.memory_space<vmem>>, %arg2: memref<8x8xf32, #tpu.memory_space<vmem>>, %arg3: memref<16x256xbf16, #tpu.memory_space<vmem>>, %arg4: memref<8x256xbf16, #tpu.memory_space<vmem>>, %arg5: memref<1x256xf32, #tpu.memory_space<vmem>>, %arg6: memref<256x256xbf16, #tpu.memory_space<vmem>>, %arg7: memref<1x256xf32, #tpu.memory_space<vmem>>, %arg8: memref<256x1xbf16, #tpu.memory_space<vmem>>, %arg9: memref<1x1xf32, #tpu.memory_space<vmem>>, %arg10: memref<1x8xf32, #tpu.memory_space<vmem>>) attributes {dimension_semantics = [#tpu.dimension_semantics<parallel>], iteration_bounds = array<i64: 1>, scalar_prefetch = 0 : i64, scratch_operands = 0 : i64, tpu.core_type = #tpu.core_type<tc>, window_params = [{transform_indices = @transform_0, window_bounds = array<i64: 8, 16>}, {transform_indices = @transform_1, window_bounds = array<i64: 8, 8>}, {pipeline_mode = #tpu.pipeline_mode<synchronous>, transform_indices = @transform_2, window_bounds = array<i64: 16, 256>}, {pipeline_mode = #tpu.pipeline_mode<synchronous>, transform_indices = @transform_3, window_bounds = array<i64: 8, 256>}, {pipeline_mode = #tpu.pipeline_mode<synchronous>, transform_indices = @transform_4, window_bounds = array<i64: 1, 256>}, {pipeline_mode = #tpu.pipeline_mode<synchronous>, transform_indices = @transform_5, window_bounds = array<i64: 256, 256>}, {pipeline_mode = #tpu.pipeline_mode<synchronous>, transform_indices = @transform_6, window_bounds = array<i64: 1, 256>}, {pipeline_mode = #tpu.pipeline_mode<synchronous>, transform_indices = @transform_7, window_bounds = array<i64: 256, 1>}, {pipeline_mode = #tpu.pipeline_mode<synchronous>, transform_indices = @transform_8, window_bounds = array<i64: 1, 1>}, {transform_indices = @transform_9, window_bounds = array<i64: 1, 8>}]} {
    %c0 = arith.constant 0 : index
    %c0_0 = arith.constant 0 : index
    %0 = vector.load %arg1[%c0, %c0_0] : memref<8x16xf32, #tpu.memory_space<vmem>>, vector<8x16xf32>
    %1 = arith.truncf %0 : vector<8x16xf32> to vector<8x16xbf16>
    %c0_1 = arith.constant 0 : index
    %c0_2 = arith.constant 0 : index
    %2 = vector.load %arg2[%c0_1, %c0_2] : memref<8x8xf32, #tpu.memory_space<vmem>>, vector<8x8xf32>
    %3 = arith.truncf %2 : vector<8x8xf32> to vector<8x8xbf16>
    %c0_3 = arith.constant 0 : index
    %c0_4 = arith.constant 0 : index
    %4 = vector.load %arg3[%c0_3, %c0_4] : memref<16x256xbf16, #tpu.memory_space<vmem>>, vector<16x256xbf16>
    %cst = arith.constant dense<0.000000e+00> : vector<8x256xf32>
    %5 = tpu.matmul %1, %4, %cst {dimension_numbers = #tpu.dot_dimension_numbers<[1], [0], [0], [1], [0, 0, 1, 1], [], []>} : vector<8x16xbf16>, vector<16x256xbf16>, vector<8x256xf32> -> vector<8x256xf32>
    %c0_5 = arith.constant 0 : index
    %c0_6 = arith.constant 0 : index
    %6 = vector.load %arg4[%c0_5, %c0_6] : memref<8x256xbf16, #tpu.memory_space<vmem>>, vector<8x256xbf16>
    %cst_7 = arith.constant dense<0.000000e+00> : vector<8x256xf32>
    %7 = tpu.matmul %3, %6, %cst_7 {dimension_numbers = #tpu.dot_dimension_numbers<[1], [0], [0], [1], [0, 0, 1, 1], [], []>} : vector<8x8xbf16>, vector<8x256xbf16>, vector<8x256xf32> -> vector<8x256xf32>
    %8 = arith.addf %5, %7 : vector<8x256xf32>
    %c0_8 = arith.constant 0 : index
    %c0_9 = arith.constant 0 : index
    %9 = vector.load %arg5[%c0_8, %c0_9] : memref<1x256xf32, #tpu.memory_space<vmem>>, vector<1x256xf32>
    %10 = vector.broadcast %9 : vector<1x256xf32> to vector<8x256xf32>
    %11 = arith.addf %8, %10 : vector<8x256xf32>
    %cst_10 = arith.constant 0.000000e+00 : f32
    %12 = vector.broadcast %cst_10 : f32 to vector<8x256xf32>
    %13 = arith.maximumf %11, %12 : vector<8x256xf32>
    %14 = arith.truncf %13 : vector<8x256xf32> to vector<8x256xbf16>
    %c0_11 = arith.constant 0 : index
    %c0_12 = arith.constant 0 : index
    %15 = vector.load %arg6[%c0_11, %c0_12] : memref<256x256xbf16, #tpu.memory_space<vmem>>, vector<256x256xbf16>
    %cst_13 = arith.constant dense<0.000000e+00> : vector<8x256xf32>
    %16 = tpu.matmul %14, %15, %cst_13 {dimension_numbers = #tpu.dot_dimension_numbers<[1], [0], [0], [1], [0, 0, 1, 1], [], []>} : vector<8x256xbf16>, vector<256x256xbf16>, vector<8x256xf32> -> vector<8x256xf32>
    %c0_14 = arith.constant 0 : index
    %c0_15 = arith.constant 0 : index
    %17 = vector.load %arg7[%c0_14, %c0_15] : memref<1x256xf32, #tpu.memory_space<vmem>>, vector<1x256xf32>
    %18 = vector.broadcast %17 : vector<1x256xf32> to vector<8x256xf32>
    %19 = arith.addf %16, %18 : vector<8x256xf32>
    %cst_16 = arith.constant 0.000000e+00 : f32
    %20 = vector.broadcast %cst_16 : f32 to vector<8x256xf32>
    %21 = arith.maximumf %19, %20 : vector<8x256xf32>
    %22 = arith.truncf %21 : vector<8x256xf32> to vector<8x256xbf16>
    %c0_17 = arith.constant 0 : index
    %c0_18 = arith.constant 0 : index
    %23 = vector.load %arg8[%c0_17, %c0_18] : memref<256x1xbf16, #tpu.memory_space<vmem>>, vector<256x1xbf16>
    %cst_19 = arith.constant dense<0.000000e+00> : vector<8x1xf32>
    %24 = tpu.matmul %22, %23, %cst_19 {dimension_numbers = #tpu.dot_dimension_numbers<[1], [0], [0], [1], [0, 0, 1, 1], [], []>} : vector<8x256xbf16>, vector<256x1xbf16>, vector<8x1xf32> -> vector<8x1xf32>
    %25 = tpu.transpose %24, [1, 0] : vector<8x1xf32> -> vector<1x8xf32>
    %c0_20 = arith.constant 0 : index
    %c0_21 = arith.constant 0 : index
    %26 = vector.load %arg9[%c0_20, %c0_21] : memref<1x1xf32, #tpu.memory_space<vmem>>, vector<1x1xf32>
    %27 = vector.broadcast %26 : vector<1x1xf32> to vector<1x8xf32>
    %28 = arith.addf %25, %27 : vector<1x8xf32>
    %c0_22 = arith.constant 0 : index
    %c0_23 = arith.constant 0 : index
    %29 = vector.load %arg10[%c0_22, %c0_23] : memref<1x8xf32, #tpu.memory_space<vmem>>, vector<1x8xf32>
    tpu.vector_store %arg10[%c0_22, %c0_23], %28 {strides = array<i32>} : memref<1x8xf32, #tpu.memory_space<vmem>>, vector<1x8xf32>,
    return
  }
  func.func @transform_0(%arg0: i32) -> (i32, i32) {
    %c0_i32 = arith.constant 0 : i32
    %c0_i32_0 = arith.constant 0 : i32
    return %arg0, %c0_i32 : i32, i32
  }
  func.func @transform_1(%arg0: i32) -> (i32, i32) {
    %c0_i32 = arith.constant 0 : i32
    %c0_i32_0 = arith.constant 0 : i32
    return %arg0, %c0_i32 : i32, i32
  }
  func.func @transform_2(%arg0: i32) -> (i32, i32) {
    %c0_i32 = arith.constant 0 : i32
    %c0_i32_0 = arith.constant 0 : i32
    %c0_i32_1 = arith.constant 0 : i32
    return %c0_i32, %c0_i32_0 : i32, i32
  }
  func.func @transform_3(%arg0: i32) -> (i32, i32) {
    %c0_i32 = arith.constant 0 : i32
    %c0_i32_0 = arith.constant 0 : i32
    %c0_i32_1 = arith.constant 0 : i32
    return %c0_i32, %c0_i32_0 : i32, i32
  }
  func.func @transform_4(%arg0: i32) -> (i32, i32) {
    %c0_i32 = arith.constant 0 : i32
    %c0_i32_0 = arith.constant 0 : i32
    %c0_i32_1 = arith.constant 0 : i32
    return %c0_i32, %c0_i32_0 : i32, i32
  }
  func.func @transform_5(%arg0: i32) -> (i32, i32) {
    %c0_i32 = arith.constant 0 : i32
    %c0_i32_0 = arith.constant 0 : i32
    %c0_i32_1 = arith.constant 0 : i32
    return %c0_i32, %c0_i32_0 : i32, i32
  }
  func.func @transform_6(%arg0: i32) -> (i32, i32) {
    %c0_i32 = arith.constant 0 : i32
    %c0_i32_0 = arith.constant 0 : i32
    %c0_i32_1 = arith.constant 0 : i32
    return %c0_i32, %c0_i32_0 : i32, i32
  }
  func.func @transform_7(%arg0: i32) -> (i32, i32) {
    %c0_i32 = arith.constant 0 : i32
    %c0_i32_0 = arith.constant 0 : i32
    %c0_i32_1 = arith.constant 0 : i32
    return %c0_i32, %c0_i32_0 : i32, i32
  }
  func.func @transform_8(%arg0: i32) -> (i32, i32) {
    %c0_i32 = arith.constant 0 : i32
    %c0_i32_0 = arith.constant 0 : i32
    %c0_i32_1 = arith.constant 0 : i32
    return %c0_i32, %c0_i32_0 : i32, i32
  }
  func.func @transform_9(%arg0: i32) -> (i32, i32) {
    %c0_i32 = arith.constant 0 : i32
    %c0_i32_0 = arith.constant 0 : i32
    return %c0_i32, %arg0 : i32, i32
  }
}

</mosaic_0001>

<bundles_post_ra>
// kernel: tpu_custom_call.1
= control target key start
LH: loop header
LB: loop body
LE: loop exit
PB: predicated region body
PF: predicated region fallthrough
CT: control target
= control target key end

     0   :  { %s1076_s0 = inlined_call_operand.vmem [shape: f32[8,16], index: 0, kind: input, shape index: {}]   ;;  %s1077_s1 = inlined_call_operand.vmem [shape: f32[8,8], index: 1, kind: input, shape index: {}]   ;;  %s1078_s2 = inlined_call_operand.vmem [shape: bf16[16,256], index: 2, kind: input, shape index: {}]   ;;  %s1079_s3 = inlined_call_operand.vmem [shape: bf16[8,256], index: 3, kind: input, shape index: {}]   ;;  %s1080_s4 = inlined_call_operand.vmem [shape: f32[1,256], index: 4, kind: input, shape index: {}]   ;;  %s1081_s5 = inlined_call_operand.hbm [shape: bf16[256,256], index: 5, kind: input, shape index: {}]   ;;  %s1082_s6 = inlined_call_operand.vmem [shape: f32[1,256], index: 6, kind: input, shape index: {}]   ;;  %s1083_s7 = inlined_call_operand.vmem [shape: bf16[256,1], index: 7, kind: input, shape index: {}]   ;;  %s1084_s8 = inlined_call_operand.<no memory space> [shape: f32[1,1], index: 8, kind: input, shape index: {}]   ;;  %s1085_s9 = inlined_call_operand.hbm [shape: f32[1,8], index: 9, kind: output, shape index: {}]  }
   0x1   :  { %v14_v0 = vstv %s1084_s8 }
   0x2   :  { %15 = vst [vmem:[#allocation2] sm:$0x1] %v14_v0 }
   0x3   :  { %16 = vsyncpa [#allocation4], 0 }
   0x4   :  { %17 = vsyncpa [#allocation5], 0  ;;  %s32_s13 = sshll.u32 %s1081_s5, 4  ;;  %s933_s14 = smov [#allocation3]   ;;  %s33_s13 = int_to_ptr.hbm [resolvable:$true] %s32_s13 }
   0x5   :  { %s34_s15 = sshll.u32 %s933_s14, 4  ;;  %s934_s16 = smov 128   ;;  %s35_s15 = int_to_ptr.vmem [resolvable:$true] %s34_s15 }
   0x6   :  { %s935_s17 = smov 8  }
   0x7   :  { %40 = dma.hbm_to_vmem [thread:$0]  %s33_s13, 4096, %s35_s15, [#allocation4], %s934_s16, %s934_s16, %s935_s17  }
   0x8   :  { %929 = dma.done.wait [#allocation4], 4096  }
   0x9   :  { %930 = vsyncadd [#allocation4], 4294963200  ;;  %v58_v1 = vld [vmem:[%s1079_s3] sm:$0xff]  ;;  %vm68_vm0 = vcmask 1043456   ;;  %v825_v5 = vld [vmem:[%s1078_s2 + $0x4] sm:$0xf0] }
   0xa   :  { %v624_v2 = vld [vmem:[%s1078_s2] sm:$0xf]  ;;  %v60_v3 = vunpack.c.l.b16 %v58_v1  ;;  %v61_v4 = vunpack.c.h.b16 %v58_v1  ;;  %v824_v6 = vld [vmem:[%s1078_s2 + $0x4] sm:$0xf]  ;;  %v626_v7 = vld [vmem:[%s1078_s2 + $0x8] sm:$0xf0] }
   0xb   :  { %v54_v8 = vld [vmem:[%s1077_s1] sm:$0xff]  ;;  %vm64_vm1 = vcmask 64512   ;;  %v625_v9 = vor.u32 %v825_v5, %v624_v2  ;;  %v690_v10 = vld [vmem:[#allocation3 + $0x70] sm:$0xf]  ;;  %v841_v11 = vld [vmem:[#allocation3 + $0x74] sm:$0xf0]  ;;  %v629_v14 = vor.u32 %v824_v6, %v626_v7 }
   0xc   :  { %v62_v12 = vpack.c.b16 %v60_v3, %v60_v3  ;;  %v63_v13 = vpack.c.b16 %v61_v4, %v61_v4  ;;  %v691_v15 = vor.u32 %v841_v11, %v690_v10  ;;  %v754_v16 = vld [vmem:[#allocation3 + $0xf0] sm:$0xf]  ;;  %v857_v17 = vld [vmem:[#allocation3 + $0xf4] sm:$0xf0]  ;;  %v840_v18 = vld [vmem:[#allocation3 + $0x74] sm:$0xf]  ;;  %v55_v25 = vpack.c.bf16 %v54_v8, %v54_v8 }
   0xd   :  { %v755_v19 = vor.u32 %v857_v17, %v754_v16  ;;  %v692_v20 = vld [vmem:[#allocation3 + $0x78] sm:$0xf0]  ;;  %v856_v21 = vld [vmem:[#allocation3 + $0xf4] sm:$0xf]  ;;  %v682_v26 = vld [vmem:[#allocation3 + $0x60] sm:$0xf] }
   0xe   :  { %v756_v22 = vld [vmem:[#allocation3 + $0xf8] sm:$0xf0]  ;;  %v70_v23 = vsel %vm68_vm0, %v62_v12, 0  ;;  %v73_v24 = vsel %vm68_vm0, %v63_v13, 0  ;;  %351 = vmatpush.bf16.msra.mxu0 %v691_v15  ;;  %v839_v27 = vld [vmem:[#allocation3 + $0x64] sm:$0xf0]  ;;  %v695_v28 = vor.u32 %v840_v18, %v692_v20 }
   0xf   :  { %82 = vmatpush.bf16.msra.mxu2 %v70_v23  ;;  %95 = vmatpush.bf16.msra.mxu3 %v73_v24  ;;  %v759_v29 = vor.u32 %v856_v21, %v756_v22  ;;  %v746_v30 = vld [vmem:[#allocation3 + $0xe0] sm:$0xf]  ;;  %v855_v31 = vld [vmem:[#allocation3 + $0xe4] sm:$0xf0]  ;;  %v838_v32 = vld [vmem:[#allocation3 + $0x64] sm:$0xf]  ;;  %v683_v33 = vor.u32 %v839_v27, %v682_v26 }
  0x10   :  { %v684_v34 = vld [vmem:[#allocation3 + $0x68] sm:$0xf0]  ;;  %v854_v35 = vld [vmem:[#allocation3 + $0xe4] sm:$0xf]  ;;  %364 = vmatpush.bf16.msra.mxu1 %v755_v19  ;;  %v747_v37 = vor.u32 %v855_v31, %v746_v30  ;;  %vm111_vm2 = vcmask 130048   ;;  %s610_s15 = sshll.u32 %s1085_s9, 4  ;;  %s611_s15 = int_to_ptr.hbm [resolvable:$true] %s610_s15 }
  0x11   :  { %v748_v36 = vld [vmem:[#allocation3 + $0xe8] sm:$0xf0]  ;;  %v687_v38 = vor.u32 %v838_v32, %v684_v34  ;;  %v52_v40 = vld [vmem:[%s1076_s0] sm:$0xff]  ;;  %v674_v42 = vld [vmem:[#allocation3 + $0x50] sm:$0xf]  ;;  %vm601_vm3 = vcmask 57344  }
  0x12   :  { %620 = vmatmul.msk.bf16.vlgmr.msra.gmra.mxu2 %vm64_vm1, %v55_v25  ;;  %621 = vmatmul.msk.bf16.vlgmr.msra.gmra.mxu3 %vm64_vm1, %v55_v25  ;;  %v751_v39 = vor.u32 %v854_v35, %v748_v36  ;;  %v53_v41 = vpack.c.bf16 %v52_v40, %v52_v40  ;;  %v837_v43 = vld [vmem:[#allocation3 + $0x54] sm:$0xf0]  ;;  %v738_v44 = vld [vmem:[#allocation3 + $0xd0] sm:$0xf]  ;;  %v836_v47 = vld [vmem:[#allocation3 + $0x54] sm:$0xf] }
  0x13   :  { %122 = vmatpush.bf16.msrb.mxu2 %v625_v9  ;;  %135 = vmatpush.bf16.msrb.mxu3 %v629_v14  ;;  %v675_v45 = vor.u32 %v837_v43, %v674_v42  ;;  %v853_v46 = vld [vmem:[#allocation3 + $0xd4] sm:$0xf0]  ;;  %v676_v48 = vld [vmem:[#allocation3 + $0x58] sm:$0xf0]  ;;  %v852_v51 = vld [vmem:[#allocation3 + $0xd4] sm:$0xf] }
  0x14   :  { %352 = vmatpush.bf16.msra.mxu0 %v683_v33  ;;  %365 = vmatpush.bf16.msra.mxu1 %v747_v37  ;;  %v739_v49 = vor.u32 %v853_v46, %v738_v44  ;;  %v679_v50 = vor.u32 %v836_v47, %v676_v48  ;;  %v740_v52 = vld [vmem:[#allocation3 + $0xd8] sm:$0xf0]  ;;  %v666_v53 = vld [vmem:[#allocation3 + $0x40] sm:$0xf]  ;;  %v835_v55 = vld [vmem:[#allocation3 + $0x44] sm:$0xf0] }
  0x15   :  { %v743_v54 = vor.u32 %v852_v51, %v740_v52  ;;  %v730_v56 = vld [vmem:[#allocation3 + $0xc0] sm:$0xf]  ;;  %v851_v57 = vld [vmem:[#allocation3 + $0xc4] sm:$0xf0]  ;;  %v667_v58 = vor.u32 %v835_v55, %v666_v53  ;;  %v834_v60 = vld [vmem:[#allocation3 + $0x44] sm:$0xf] }
  0x16   :  { %v731_v59 = vor.u32 %v851_v57, %v730_v56  ;;  %v668_v61 = vld [vmem:[#allocation3 + $0x48] sm:$0xf0]  ;;  %v850_v62 = vld [vmem:[#allocation3 + $0xc4] sm:$0xf]  ;;  %v658_v2 = vld [vmem:[#allocation3 + $0x30] sm:$0xf] }
  0x17   :  { %377 = vmatpush.bf16.msra.mxu2 %v695_v28  ;;  %390 = vmatpush.bf16.msra.mxu3 %v759_v29  ;;  %v671_v63 = vor.u32 %v834_v60, %v668_v61  ;;  %v732_v0 = vld [vmem:[#allocation3 + $0xc8] sm:$0xf0]  ;;  %v833_v3 = vld [vmem:[#allocation3 + $0x34] sm:$0xf0]  ;;  %v722_v4 = vld [vmem:[#allocation3 + $0xb0] sm:$0xf] }
  0x18   :  { %353 = vmatpush.bf16.msra.mxu0 %v675_v45  ;;  %366 = vmatpush.bf16.msra.mxu1 %v739_v49  ;;  %v735_v1 = vor.u32 %v850_v62, %v732_v0  ;;  %v659_v5 = vor.u32 %v833_v3, %v658_v2  ;;  %v849_v6 = vld [vmem:[#allocation3 + $0xb4] sm:$0xf0]  ;;  %v832_v7 = vld [vmem:[#allocation3 + $0x34] sm:$0xf]  ;;  %v660_v8 = vld [vmem:[#allocation3 + $0x38] sm:$0xf0] }
  0x19   :  { %v723_v9 = vor.u32 %v849_v6, %v722_v4  ;;  %v663_v10 = vor.u32 %v832_v7, %v660_v8  ;;  %v848_v11 = vld [vmem:[#allocation3 + $0xb4] sm:$0xf]  ;;  %v724_v12 = vld [vmem:[#allocation3 + $0xb8] sm:$0xf0]  ;;  %v650_v13 = vld [vmem:[#allocation3 + $0x20] sm:$0xf] }
  0x1a   :  { %v727_v14 = vor.u32 %v848_v11, %v724_v12  ;;  %v831_v15 = vld [vmem:[#allocation3 + $0x24] sm:$0xf0]  ;;  %v714_v16 = vld [vmem:[#allocation3 + $0xa0] sm:$0xf]  ;;  %v830_v20 = vld [vmem:[#allocation3 + $0x24] sm:$0xf] }
  0x1b   :  { %378 = vmatpush.bf16.msra.mxu2 %v687_v38  ;;  %391 = vmatpush.bf16.msra.mxu3 %v751_v39  ;;  %v847_v17 = vld [vmem:[#allocation3 + $0xa4] sm:$0xf0]  ;;  %v651_v18 = vor.u32 %v831_v15, %v650_v13  ;;  %v652_v21 = vld [vmem:[#allocation3 + $0x28] sm:$0xf0]  ;;  %v846_v22 = vld [vmem:[#allocation3 + $0xa4] sm:$0xf] }
  0x1c   :  { %354 = vmatpush.bf16.msra.mxu0 %v667_v58  ;;  %367 = vmatpush.bf16.msra.mxu1 %v731_v59  ;;  %v715_v19 = vor.u32 %v847_v17, %v714_v16  ;;  %v655_v23 = vor.u32 %v830_v20, %v652_v21  ;;  %v716_v24 = vld [vmem:[#allocation3 + $0xa8] sm:$0xf0]  ;;  %v642_v26 = vld [vmem:[#allocation3 + $0x10] sm:$0xf]  ;;  %v829_v27 = vld [vmem:[#allocation3 + $0x14] sm:$0xf0] }
  0x1d   :  { %v719_v25 = vor.u32 %v846_v22, %v716_v24  ;;  %v706_v28 = vld [vmem:[#allocation3 + $0x90] sm:$0xf]  ;;  %v643_v29 = vor.u32 %v829_v27, %v642_v26  ;;  %v845_v30 = vld [vmem:[#allocation3 + $0x94] sm:$0xf0]  ;;  %v828_v31 = vld [vmem:[#allocation3 + $0x14] sm:$0xf] }
  0x1e   :  { %v644_v32 = vld [vmem:[#allocation3 + $0x18] sm:$0xf0]  ;;  %v707_v33 = vor.u32 %v845_v30, %v706_v28  ;;  %v844_v35 = vld [vmem:[#allocation3 + $0x94] sm:$0xf]  ;;  %v634_v37 = vld [vmem:[#allocation3] sm:$0xf] }
  0x1f   :  { %379 = vmatpush.bf16.msra.mxu2 %v679_v50  ;;  %392 = vmatpush.bf16.msra.mxu3 %v743_v54  ;;  %v647_v34 = vor.u32 %v828_v31, %v644_v32  ;;  %v708_v36 = vld [vmem:[#allocation3 + $0x98] sm:$0xf0]  ;;  %v827_v39 = vld [vmem:[#allocation3 + $0x4] sm:$0xf0]  ;;  %v698_v40 = vld [vmem:[#allocation3 + $0x80] sm:$0xf] }
  0x20   :  { %355 = vmatpush.bf16.msra.mxu0 %v659_v5  ;;  %368 = vmatpush.bf16.msra.mxu1 %v723_v9  ;;  %v711_v38 = vor.u32 %v844_v35, %v708_v36  ;;  %v635_v42 = vor.u32 %v827_v39, %v634_v37  ;;  %v826_v44 = vld [vmem:[#allocation3 + $0x4] sm:$0xf]  ;;  %v636_v45 = vld [vmem:[#allocation3 + $0x8] sm:$0xf0]  ;;  %v865_v50 = vld [vmem:[%s1083_s7 + $0x38] sm:$0xff]  ;;  %v936_v22 = vmov 0  }
  0x21   :  { %v842_v46 = vld [vmem:[#allocation3 + $0x84] sm:$0xf]  ;;  %v639_v47 = vor.u32 %v826_v44, %v636_v45  ;;  %v700_v48 = vld [vmem:[#allocation3 + $0x88] sm:$0xf0]  ;;  %v873_v51 = vld [vmem:[%s1083_s7 + $0x78] sm:$0xff]  ;;  %880 = vset.pattern.permute.xlu0 %v936_v22 }
  0x22   :  { %630 = vmatmul.msk.bf16.vlgmr.msrb.gmra.mxu2 %vm111_vm2, %v53_v41  ;;  %631 = vmatmul.msk.bf16.vlgmr.msrb.gmra.mxu3 %vm111_vm2, %v53_v41  ;;  %v843_v41 = vld [vmem:[#allocation3 + $0x84] sm:$0xf0]  ;;  %v703_v49 = vor.u32 %v842_v46, %v700_v48  ;;  %v864_v52 = vld [vmem:[%s1083_s7 + $0x30] sm:$0xff]  ;;  %v862_v58 = vld [vmem:[%s1083_s7 + $0x20] sm:$0xff] }
  0x23   :  { %380 = vmatpush.bf16.msra.mxu2 %v671_v63  ;;  %393 = vmatpush.bf16.msra.mxu3 %v735_v1  ;;  %v699_v43 = vor.u32 %v843_v41, %v698_v40  ;;  %v872_v53 = vld [vmem:[%s1083_s7 + $0x70] sm:$0xff]  ;;  %v863_v56 = vld [vmem:[%s1083_s7 + $0x28] sm:$0xff]  ;;  %v870_v59 = vld [vmem:[%s1083_s7 + $0x60] sm:$0xff] }
  0x24   :  { %356 = vmatpush.bf16.msra.mxu0 %v651_v18  ;;  %369 = vmatpush.bf16.msra.mxu1 %v715_v19  ;;  %v871_v57 = vld [vmem:[%s1083_s7 + $0x68] sm:$0xff]  ;;  %v861_v62 = vld [vmem:[%s1083_s7 + $0x18] sm:$0xff]  ;;  %v141_v63 = vld [vmem:[%s1080_s4] sm:$0x3] }
  0x25   :  { %v860_v0 = vld [vmem:[%s1083_s7 + $0x10] sm:$0xff]  ;;  %v143_v1 = vperm.slane %v141_v63, 0  ;;  %v144_v2 = vperm.slane %v141_v63, 1  ;;  %v869_v15 = vld [vmem:[%s1083_s7 + $0x58] sm:$0xff]  ;;  %v859_v16 = vld [vmem:[%s1083_s7 + $0x8] sm:$0xff] }
  0x26   :  { %v868_v17 = vld [vmem:[%s1083_s7 + $0x50] sm:$0xff]  ;;  %v858_v18 = vld [vmem:[%s1083_s7] sm:$0xff]  ;;  %v867_v19 = vld [vmem:[%s1083_s7 + $0x48] sm:$0xff] }
  0x27   :  { %381 = vmatpush.bf16.msra.mxu2 %v663_v10  ;;  %394 = vmatpush.bf16.msra.mxu3 %v727_v14  ;;  %v866_v20 = vld [vmem:[%s1083_s7 + $0x40] sm:$0xff] }
  0x28   :  { %357 = vmatpush.bf16.msra.mxu0 %v643_v29  ;;  %370 = vmatpush.bf16.msra.mxu1 %v707_v33  ;;  %v593_v21 = vld [vmem:[#allocation2] sm:$0x1] }
  0x29   :  { %596 = vperm.xlu0 %880, %v593_v21  }
  0x2b   :  { %382 = vmatpush.bf16.msra.mxu2 %v655_v23  ;;  %395 = vmatpush.bf16.msra.mxu3 %v719_v25  ;;  %v185_v23 = vld [vmem:[%s1082_s6] sm:$0x3]  ;;  %s937_s6 = smov [#allocation6]  }
  0x2c   :  { %358 = vmatpush.bf16.msra.mxu0 %v635_v42  ;;  %371 = vmatpush.bf16.msra.mxu1 %v699_v43  ;;  %v187_v24 = vperm.slane %v185_v23, 0  ;;  %v188_v29 = vperm.slane %v185_v23, 1  ;;  %s608_s7 = sshll.u32 %s937_s6, 4  ;;  %s609_s7 = int_to_ptr.vmem [resolvable:$true] %s608_s7 }
  0x2f   :  { %383 = vmatpush.bf16.msra.mxu2 %v647_v34  ;;  %396 = vmatpush.bf16.msra.mxu3 %v711_v38 }
  0x30   :  { %535 = vmatpush.bf16.msrb.mxu0 %v865_v50  ;;  %548 = vmatpush.bf16.msrb.mxu1 %v873_v51 }
  0x33   :  { %384 = vmatpush.bf16.msra.mxu2 %v639_v47  ;;  %397 = vmatpush.bf16.msra.mxu3 %v703_v49 }
  0x34   :  { %536 = vmatpush.bf16.msrb.mxu0 %v864_v52  ;;  %549 = vmatpush.bf16.msrb.mxu1 %v872_v53 }
  0x38   :  { %537 = vmatpush.bf16.msrb.mxu0 %v863_v56  ;;  %550 = vmatpush.bf16.msrb.mxu1 %v871_v57 }
  0x3c   :  { %538 = vmatpush.bf16.msrb.mxu0 %v862_v58  ;;  %551 = vmatpush.bf16.msrb.mxu1 %v870_v59 }
  0x40   :  { %539 = vmatpush.bf16.msrb.mxu0 %v861_v62  ;;  %552 = vmatpush.bf16.msrb.mxu1 %v869_v15 }
  0x44   :  { %540 = vmatpush.bf16.msrb.mxu0 %v860_v0  ;;  %553 = vmatpush.bf16.msrb.mxu1 %v868_v17 }
  0x48   :  { %541 = vmatpush.bf16.msrb.mxu0 %v859_v16  ;;  %554 = vmatpush.bf16.msrb.mxu1 %v867_v19 }
  0x4c   :  { %542 = vmatpush.bf16.msrb.mxu0 %v858_v18  ;;  %555 = vmatpush.bf16.msrb.mxu1 %v866_v20 }
  0x95   :  { %v84_v54 = vpop.f32.mrf.mxu2  ;;  %v97_v55 = vpop.f32.mrf.mxu3 }
  0x9b   :  { %v597_v47 = vpop.permute.xlu0 %596 }
  0x9c   :  { %v599_v48 = vperm.slane %v597_v47, 0 }
  0x9d   :  { %v86_v60 = vpop.f32.mrf.mxu2  ;;  %v99_v61 = vpop.f32.mrf.mxu3 }
  0xa5   :  { %v124_v3 = vpop.f32.mrf.mxu2  ;;  %v137_v4 = vpop.f32.mrf.mxu3 }
  0xa6   :  { %v125_v5 = vadd.f32 %v124_v3, %v84_v54  ;;  %v138_v6 = vadd.f32 %v137_v4, %v97_v55 }
  0xa8   :  { %v147_v7 = vadd.f32 %v143_v1, %v125_v5  ;;  %v148_v8 = vadd.f32 %v144_v2, %v138_v6 }
  0xaa   :  { %v149_v9 = vmax.f32 %v147_v7, 0.0  ;;  %v150_v10 = vmax.f32 %v148_v8, 0.0 }
  0xac   :  { %v151_v11 = vpack.c.bf16 %v149_v9, %v149_v9  ;;  %v152_v12 = vpack.c.bf16 %v150_v10, %v150_v10 }
  0xad   :  { %v126_v13 = vpop.f32.mrf.mxu2  ;;  %v139_v14 = vpop.f32.mrf.mxu3 }
  0xae   :  { %359 = vmatmul.bf16.vlgmr.msra.gmra.mxu0 %v151_v11  ;;  %372 = vmatmul.bf16.vlgmr.msra.gmra.mxu1 %v152_v12 }
  0xaf   :  { %385 = vmatmul.bf16.vlgmr.msra.gmra.mxu2 %v151_v11  ;;  %398 = vmatmul.bf16.vlgmr.msra.gmra.mxu3 %v152_v12 }
 0x12b   :  { %v360_v25 = vpop.f32.mrf.mxu0  ;;  %v373_v26 = vpop.f32.mrf.mxu1 }
 0x12c   :  { %v361_v27 = vadd.f32 %v360_v25, %v187_v24 }
 0x12e   :  { %v374_v28 = vadd.f32 %v373_v26, %v361_v27 }
 0x130   :  { %v403_v30 = vmax.f32 %v374_v28, 0.0 }
 0x132   :  { %v405_v31 = vpack.c.bf16 %v403_v30, %v403_v30  ;;  %v386_v32 = vpop.f32.mrf.mxu2  ;;  %v399_v33 = vpop.f32.mrf.mxu3 }
 0x133   :  { %v387_v34 = vadd.f32 %v386_v32, %v188_v29  ;;  %v362_v35 = vpop.f32.mrf.mxu0  ;;  %v375_v36 = vpop.f32.mrf.mxu1 }
 0x134   :  { %543 = vmatmul.bf16.vlgmr.msrb.gmra.mxu0 %v405_v31 }
 0x135   :  { %v400_v37 = vadd.f32 %v399_v33, %v387_v34 }
 0x137   :  { %v404_v38 = vmax.f32 %v400_v37, 0.0 }
 0x139   :  { %v406_v39 = vpack.c.bf16 %v404_v38, %v404_v38 }
 0x13a   :  { %v388_v40 = vpop.f32.mrf.mxu2  ;;  %v401_v41 = vpop.f32.mrf.mxu3 }
 0x13b   :  { %556 = vmatmul.bf16.vlgmr.msrb.gmra.mxu1 %v406_v39 }
 0x1b1   :  { %v544_v42 = vpop.f32.mrf.mxu0 }
 0x1b8   :  { %v557_v43 = vpop.f32.mrf.mxu1 }
 0x1b9   :  { %v558_v44 = vadd.f32 %v557_v43, %v544_v42  ;;  %v546_v45 = vpop.f32.mrf.mxu0 }
 0x1bb   :  { %561 = vxpose.xlu0.b32.start.end [1/1] (short) (narrow) %v558_v44, 8 }
 0x1c0   :  { %v559_v46 = vpop.f32.mrf.mxu1 }
 0x25f   :  { %v577_v49 = vpop.trf.xlu0 }
 0x260   :  { %v600_v50 = vadd.f32 %v599_v48, %v577_v49 }
 0x262   :  { %602 = vst.msk [vmem:[#allocation6] sm:$0x1] %vm601_vm3, %v600_v50 }
 0x263   :  { %613 = dma.vmem_to_hbm [thread:$0]  %s609_s7, 16, %s611_s15, [#allocation5]  }
 0x264   :  { %931 = dma.done.wait [#allocation5], 16  }
 0x265   :  { %932 = vsyncadd [#allocation5], 4294967280 }
 0x266   :  { %618 = vsyncpa [#allocation4], 1 }
 0x267   :  { %619 = vsyncpa [#allocation5], 1 }

</bundles_post_ra>
